<compile_context>
chip_gen: v7x
topology: tpu7x:2x2x1
jax: 0.10.0
libtpu: 0.0.40
codegen_flags: <defaults>
</compile_context>

<pallas_src>
import functools

import jax
import jax.numpy as jnp
from jax.experimental import pallas as pl
from jax.experimental.pallas import tpu as pltpu

# ---- model hyper-parameters (match the PyTorch module) ---------------------
INP_STATE_DIM = 24
OPP_STATE_DIM = 8
N_ACTIONS = 4
HIDDEN_INP = 128
HIDDEN_OPP = 10
HIDDEN_COMMON = 128

IN_TOTAL = INP_STATE_DIM + OPP_STATE_DIM          # 32
H1_PAD = 256                                      # 128 + 10 padded to lane multiple
OUT_PAD = 128                                     # lane-dense output


def _round_up(v, m):
    return ((v + m - 1) // m) * m


# ----------------------------------------------------------------------------
# Kernel: one batch tile -> three MXU matmuls + two ReLUs, all in VMEM.
# ----------------------------------------------------------------------------
def ddqn_kernel(x_ref, w1_ref, b1_ref, w3_ref, b3_ref, w4_ref, b4_ref, out_ref):
    # fused branch layer: Linear(32 -> 256 block-diagonal) + ReLU
    h = jnp.dot(x_ref[...], w1_ref[...],
                preferred_element_type=jnp.float32) + b1_ref[...]
    h = jnp.maximum(h, 0.0)

    # common net layer 1: Linear(256[padded concat] -> 128) + ReLU
    hc = jnp.dot(h, w3_ref[...],
                 preferred_element_type=jnp.float32) + b3_ref[...]
    hc = jnp.maximum(hc, 0.0)

    # common net layer 2: Linear(128 -> 128[padded n_actions]), lane-dense store
    out_ref[...] = jnp.dot(hc, w4_ref[...],
                           preferred_element_type=jnp.float32) + b4_ref[...]


# ----------------------------------------------------------------------------
# One-time parameter preparation (transpose / block-diagonal packing / padding)
# ----------------------------------------------------------------------------
def prepare_params(params):
    """PyTorch-layout params -> kernel-layout params. Call once at load time."""
    w1, b1, w2, b2, w3, b3, w4, b4 = params

    # block-diagonal first layer: (32, 256)
    W1 = jnp.zeros((IN_TOTAL, H1_PAD), jnp.float32)
    W1 = W1.at[:INP_STATE_DIM, :HIDDEN_INP].set(w1.T)
    W1 = W1.at[INP_STATE_DIM:, HIDDEN_INP:HIDDEN_INP + HIDDEN_OPP].set(w2.T)
    B1 = jnp.zeros((1, H1_PAD), jnp.float32)
    B1 = B1.at[0, :HIDDEN_INP].set(b1)
    B1 = B1.at[0, HIDDEN_INP:HIDDEN_INP + HIDDEN_OPP].set(b2)

    # common layer 1: rows 0..127 multiply h1, rows 128..137 multiply h2,
    # rows 138..255 multiply the zero padding -> zero rows.
    w3t = w3.T                                    # (138, 128)
    W3 = jnp.zeros((H1_PAD, HIDDEN_COMMON), jnp.float32)
    W3 = W3.at[:HIDDEN_INP, :].set(w3t[:HIDDEN_INP])
    W3 = W3.at[HIDDEN_INP:HIDDEN_INP + HIDDEN_OPP, :].set(w3t[HIDDEN_INP:])
    B3 = b3.reshape(1, HIDDEN_COMMON)

    # output layer padded to 128 lanes (zero columns beyond n_actions)
    W4 = jnp.zeros((HIDDEN_COMMON, OUT_PAD), jnp.float32)
    W4 = W4.at[:, :N_ACTIONS].set(w4.T)
    B4 = jnp.zeros((1, OUT_PAD), jnp.float32)
    B4 = B4.at[0, :N_ACTIONS].set(b4)

    return (W1, B1, W3, B3, W4, B4)


# ----------------------------------------------------------------------------
# Forward wrapper: batch-tiled grid, weights resident in VMEM.
# ----------------------------------------------------------------------------
@functools.partial(jax.jit, static_argnames=("block_b",))
def ddqn_forward(x, prepped_params, block_b=512):
    """x: (B, 32) float32 -> (B, N_ACTIONS) float32."""
    W1, B1, W3, B3, W4, B4 = prepped_params
    B = x.shape[0]

    # batch tile: multiple of 8 sublanes, capped at block_b
    TB = min(_round_up(block_b, 8), _round_up(B, 8))
    n_blocks = pl.cdiv(B, TB)
    B_pad = n_blocks * TB
    if B_pad != B:
        x = jnp.pad(x, ((0, B_pad - B), (0, 0)))

    def resident(shape):
        # weight/bias stays in VMEM across all grid steps (constant block idx)
        return pl.BlockSpec(shape, lambda i: (0, 0))

    out = pl.pallas_call(
        ddqn_kernel,
        out_shape=jax.ShapeDtypeStruct((B_pad, OUT_PAD), jnp.float32),
        grid=(n_blocks,),
        in_specs=[
            pl.BlockSpec((TB, IN_TOTAL), lambda i: (i, 0)),   # x tile
            resident(W1.shape), resident(B1.shape),
            resident(W3.shape), resident(B3.shape),
            resident(W4.shape), resident(B4.shape),
        ],
        out_specs=pl.BlockSpec((TB, OUT_PAD), lambda i: (i, 0)),
        compiler_params=pltpu.CompilerParams(
            dimension_semantics=("parallel",),
        ),
    )(x, W1, B1, W3, B3, W4, B4)

    return out[:B, :N_ACTIONS]


# ----------------------------------------------------------------------------
# Init + pure-JAX reference (matches the PyTorch forward exactly)
# ----------------------------------------------------------------------------
def init_params(key):
    """Deterministic init mimicking PyTorch Linear default (Kaiming uniform)."""
    def linear(key, out_f, in_f):
        kw, kb = jax.random.split(key)
        bound = 1.0 / jnp.sqrt(in_f)
        w = jax.random.uniform(kw, (out_f, in_f), jnp.float32, -bound, bound)
        b = jax.random.uniform(kb, (out_f,), jnp.float32, -bound, bound)
        return w, b

    k1, k2, k3, k4 = jax.random.split(key, 4)
    w1, b1 = linear(k1, HIDDEN_INP, INP_STATE_DIM)
    w2, b2 = linear(k2, HIDDEN_OPP, OPP_STATE_DIM)
    w3, b3 = linear(k3, HIDDEN_COMMON, HIDDEN_INP + HIDDEN_OPP)
    w4, b4 = linear(k4, N_ACTIONS, HIDDEN_COMMON)
    return (w1, b1, w2, b2, w3, b3, w4, b4)


def ddqn_reference(x, params):
    w1, b1, w2, b2, w3, b3, w4, b4 = params
    x1 = x[..., :INP_STATE_DIM]
    x2 = x[..., INP_STATE_DIM:]
    h1 = jnp.maximum(x1 @ w1.T + b1, 0.0)
    h2 = jnp.maximum(x2 @ w2.T + b2, 0.0)
    h = jnp.concatenate([h1, h2], axis=-1)
    h = jnp.maximum(h @ w3.T + b3, 0.0)
    return h @ w4.T + b4


if __name__ == "__main__":
    key = jax.random.PRNGKey(0)
    kx, kx2, kp = jax.random.split(key, 3)

    params = init_params(kp)
    prepped = prepare_params(params)

    # small batch: single grid step
    B = 8
    x = jax.random.normal(kx, (B, IN_TOTAL), jnp.float32)
    out = jax.block_until_ready(ddqn_forward(x, prepped))
    ref = ddqn_reference(x, params)
    assert out.shape == (B, N_ACTIONS)
    assert jnp.allclose(out, ref, atol=1e-4, rtol=1e-4), "mismatch vs reference (B=8)"

    # non-divisible batch with a small tile: exercises the grid + row padding
    B2 = 40
    x2 = jax.random.normal(kx2, (B2, IN_TOTAL), jnp.float32)
    out2 = jax.block_until_ready(ddqn_forward(x2, prepped, block_b=16))
    ref2 = ddqn_reference(x2, params)
    assert out2.shape == (B2, N_ACTIONS)
    assert jnp.allclose(out2, ref2, atol=1e-4, rtol=1e-4), "mismatch vs reference (B=40)"

    print("KERNEL_OK")
</pallas_src>

<mosaic_0001>
module attributes {stable_mosaic.version = 11 : i64} {
  func.func @ddqn_kernel(%arg0: i32, %arg1: memref<8x32xf32, #tpu.memory_space<vmem>>, %arg2: memref<32x256xf32, #tpu.memory_space<vmem>>, %arg3: memref<1x256xf32, #tpu.memory_space<vmem>>, %arg4: memref<256x128xf32, #tpu.memory_space<vmem>>, %arg5: memref<1x128xf32, #tpu.memory_space<vmem>>, %arg6: memref<128x128xf32, #tpu.memory_space<vmem>>, %arg7: memref<1x128xf32, #tpu.memory_space<vmem>>, %arg8: memref<8x128xf32, #tpu.memory_space<vmem>>) attributes {dimension_semantics = [#tpu.dimension_semantics<parallel>], iteration_bounds = array<i64: 1>, scalar_prefetch = 0 : i64, scratch_operands = 0 : i64, tpu.core_type = #tpu.core_type<tc>, window_params = [{transform_indices = @transform_0, window_bounds = array<i64: 8, 32>}, {pipeline_mode = #tpu.pipeline_mode<synchronous>, transform_indices = @transform_1, window_bounds = array<i64: 32, 256>}, {pipeline_mode = #tpu.pipeline_mode<synchronous>, transform_indices = @transform_2, window_bounds = array<i64: 1, 256>}, {pipeline_mode = #tpu.pipeline_mode<synchronous>, transform_indices = @transform_3, window_bounds = array<i64: 256, 128>}, {pipeline_mode = #tpu.pipeline_mode<synchronous>, transform_indices = @transform_4, window_bounds = array<i64: 1, 128>}, {pipeline_mode = #tpu.pipeline_mode<synchronous>, transform_indices = @transform_5, window_bounds = array<i64: 128, 128>}, {pipeline_mode = #tpu.pipeline_mode<synchronous>, transform_indices = @transform_6, window_bounds = array<i64: 1, 128>}, {transform_indices = @transform_7, window_bounds = array<i64: 8, 128>}]} {
    %c0 = arith.constant 0 : index
    %c0_0 = arith.constant 0 : index
    %0 = vector.load %arg1[%c0, %c0_0] : memref<8x32xf32, #tpu.memory_space<vmem>>, vector<8x32xf32>
    %c0_1 = arith.constant 0 : index
    %c0_2 = arith.constant 0 : index
    %1 = vector.load %arg2[%c0_1, %c0_2] : memref<32x256xf32, #tpu.memory_space<vmem>>, vector<32x256xf32>
    %cst = arith.constant dense<0.000000e+00> : vector<8x256xf32>
    %2 = tpu.matmul %0, %1, %cst {dimension_numbers = #tpu.dot_dimension_numbers<[1], [0], [0], [1], [0, 0, 1, 1], [], []>} : vector<8x32xf32>, vector<32x256xf32>, vector<8x256xf32> -> vector<8x256xf32>
    %c0_3 = arith.constant 0 : index
    %c0_4 = arith.constant 0 : index
    %3 = vector.load %arg3[%c0_3, %c0_4] : memref<1x256xf32, #tpu.memory_space<vmem>>, vector<1x256xf32>
    %4 = vector.broadcast %3 : vector<1x256xf32> to vector<8x256xf32>
    %5 = arith.addf %2, %4 : vector<8x256xf32>
    %cst_5 = arith.constant 0.000000e+00 : f32
    %6 = vector.broadcast %cst_5 : f32 to vector<8x256xf32>
    %7 = arith.maximumf %5, %6 : vector<8x256xf32>
    %c0_6 = arith.constant 0 : index
    %c0_7 = arith.constant 0 : index
    %8 = vector.load %arg4[%c0_6, %c0_7] : memref<256x128xf32, #tpu.memory_space<vmem>>, vector<256x128xf32>
    %cst_8 = arith.constant dense<0.000000e+00> : vector<8x128xf32>
    %9 = tpu.matmul %7, %8, %cst_8 {dimension_numbers = #tpu.dot_dimension_numbers<[1], [0], [0], [1], [0, 0, 1, 1], [], []>} : vector<8x256xf32>, vector<256x128xf32>, vector<8x128xf32> -> vector<8x128xf32>
    %c0_9 = arith.constant 0 : index
    %c0_10 = arith.constant 0 : index
    %10 = vector.load %arg5[%c0_9, %c0_10] : memref<1x128xf32, #tpu.memory_space<vmem>>, vector<1x128xf32>
    %11 = vector.broadcast %10 : vector<1x128xf32> to vector<8x128xf32>
    %12 = arith.addf %9, %11 : vector<8x128xf32>
    %cst_11 = arith.constant 0.000000e+00 : f32
    %13 = vector.broadcast %cst_11 : f32 to vector<8x128xf32>
    %14 = arith.maximumf %12, %13 : vector<8x128xf32>
    %c0_12 = arith.constant 0 : index
    %c0_13 = arith.constant 0 : index
    %15 = vector.load %arg6[%c0_12, %c0_13] : memref<128x128xf32, #tpu.memory_space<vmem>>, vector<128x128xf32>
    %cst_14 = arith.constant dense<0.000000e+00> : vector<8x128xf32>
    %16 = tpu.matmul %14, %15, %cst_14 {dimension_numbers = #tpu.dot_dimension_numbers<[1], [0], [0], [1], [0, 0, 1, 1], [], []>} : vector<8x128xf32>, vector<128x128xf32>, vector<8x128xf32> -> vector<8x128xf32>
    %c0_15 = arith.constant 0 : index
    %c0_16 = arith.constant 0 : index
    %17 = vector.load %arg7[%c0_15, %c0_16] : memref<1x128xf32, #tpu.memory_space<vmem>>, vector<1x128xf32>
    %18 = vector.broadcast %17 : vector<1x128xf32> to vector<8x128xf32>
    %19 = arith.addf %16, %18 : vector<8x128xf32>
    %c0_17 = arith.constant 0 : index
    %c0_18 = arith.constant 0 : index
    %20 = vector.load %arg8[%c0_17, %c0_18] : memref<8x128xf32, #tpu.memory_space<vmem>>, vector<8x128xf32>
    tpu.vector_store %arg8[%c0_17, %c0_18], %19 {strides = array<i32>} : memref<8x128xf32, #tpu.memory_space<vmem>>, vector<8x128xf32>,
    return
  }
  func.func @transform_0(%arg0: i32) -> (i32, i32) {
    %c0_i32 = arith.constant 0 : i32
    %c0_i32_0 = arith.constant 0 : i32
    return %arg0, %c0_i32 : i32, i32
  }
  func.func @transform_1(%arg0: i32) -> (i32, i32) {
    %c0_i32 = arith.constant 0 : i32
    %c0_i32_0 = arith.constant 0 : i32
    %c0_i32_1 = arith.constant 0 : i32
    return %c0_i32, %c0_i32_0 : i32, i32
  }
  func.func @transform_2(%arg0: i32) -> (i32, i32) {
    %c0_i32 = arith.constant 0 : i32
    %c0_i32_0 = arith.constant 0 : i32
    %c0_i32_1 = arith.constant 0 : i32
    return %c0_i32, %c0_i32_0 : i32, i32
  }
  func.func @transform_3(%arg0: i32) -> (i32, i32) {
    %c0_i32 = arith.constant 0 : i32
    %c0_i32_0 = arith.constant 0 : i32
    %c0_i32_1 = arith.constant 0 : i32
    return %c0_i32, %c0_i32_0 : i32, i32
  }
  func.func @transform_4(%arg0: i32) -> (i32, i32) {
    %c0_i32 = arith.constant 0 : i32
    %c0_i32_0 = arith.constant 0 : i32
    %c0_i32_1 = arith.constant 0 : i32
    return %c0_i32, %c0_i32_0 : i32, i32
  }
  func.func @transform_5(%arg0: i32) -> (i32, i32) {
    %c0_i32 = arith.constant 0 : i32
    %c0_i32_0 = arith.constant 0 : i32
    %c0_i32_1 = arith.constant 0 : i32
    return %c0_i32, %c0_i32_0 : i32, i32
  }
  func.func @transform_6(%arg0: i32) -> (i32, i32) {
    %c0_i32 = arith.constant 0 : i32
    %c0_i32_0 = arith.constant 0 : i32
    %c0_i32_1 = arith.constant 0 : i32
    return %c0_i32, %c0_i32_0 : i32, i32
  }
  func.func @transform_7(%arg0: i32) -> (i32, i32) {
    %c0_i32 = arith.constant 0 : i32
    %c0_i32_0 = arith.constant 0 : i32
    return %arg0, %c0_i32 : i32, i32
  }
}

</mosaic_0001>

<bundles_post_ra>
// kernel: ddqn_forward.1
= control target key start
LH: loop header
LB: loop body
LE: loop exit
PB: predicated region body
PF: predicated region fallthrough
CT: control target
= control target key end

     0   :  { %12 = vsyncpa [#allocation3], 0  ;;  %s760_s0 = inlined_call_operand.hbm [shape: f32[8,32], index: 0, kind: input, shape index: {}]   ;;  %s761_s1 = inlined_call_operand.hbm [shape: f32[32,256], index: 1, kind: input, shape index: {}]   ;;  %s762_s2 = inlined_call_operand.vmem [shape: f32[1,256], index: 2, kind: input, shape index: {}]   ;;  %s763_s3 = inlined_call_operand.hbm [shape: f32[256,128], index: 3, kind: input, shape index: {}]   ;;  %s764_s4 = inlined_call_operand.vmem [shape: f32[1,128], index: 4, kind: input, shape index: {}]   ;;  %s765_s5 = inlined_call_operand.hbm [shape: f32[128,128], index: 5, kind: input, shape index: {}]   ;;  %s766_s6 = inlined_call_operand.vmem [shape: f32[1,128], index: 6, kind: input, shape index: {}]   ;;  %s767_s7 = inlined_call_operand.vmem [shape: f32[8,128], index: 7, kind: output, shape index: {}]  }
   0x1   :  { %13 = vsyncpa [#allocation5], 0 }
   0x2   :  { %14 = vsyncpa [#allocation8], 0  ;;  %s647_s24 = smov [#allocation4]   ;;  %s553_s28 = scalar_lea.hbm %s761_s1, 1024 }
   0x3   :  { %s30_s25 = sshll.u32 %s647_s24, 4  ;;  %p554_p0 = scmp.ne.s32.totalorder %s761_s1, %s553_s28  ;;  %s31_s25 = int_to_ptr.vmem [resolvable:$true] %s30_s25 }
   0x4   :  { %p557_p1 = scmp.lt.u32.totalorder %s553_s28, %s761_s1 }
   0x6   :  { %p559_p2 = pnand %p557_p1, %p554_p0 }
   0x8   :  { %562 = shalt.err (!%p559_p2)
}
   0x9   :  { %s563_s10 = scalar_lea.vmem %s31_s25, 1024  ;;  %p568_p4 = scmp.lt.s32.totalorder %s31_s25, %s31_s25 }
   0xa   :  { %p564_p3 = scmp.ne.s32.totalorder %s31_s25, %s563_s10  ;;  %p569_p5 = scmp.lt.s32.totalorder %s563_s10, %s563_s10 }
   0xc   :  { %p570_p6 = por %p569_p5, %p568_p4 }
   0xe   :  { %p571_p7 = pnand %p570_p6, %p564_p3 }
  0x10   :  { %574 = shalt.err (!%p571_p7)
}
  0x11   :  { %s648_s11 = smov 256   ;;  %s649_s12 = smov 16  }
  0x12   :  { %36 = dma.hbm_to_vmem [thread:$0]  %s761_s1, 1024, %s31_s25, [#allocation5], %s648_s11, %s648_s11, %s649_s12  }
  0x13   :  { %s650_s15 = smov [#allocation2]   ;;  %s651_s17 = smov [#allocation6]  }
  0x14   :  { %s21_s16 = sshll.u32 %s650_s15, 4  ;;  %s44_s18 = sshll.u32 %s651_s17, 4  ;;  %s22_s16 = int_to_ptr.vmem [resolvable:$true] %s21_s16  ;;  %s45_s18 = int_to_ptr.vmem [resolvable:$true] %s44_s18 }
  0x15   :  { %s575_s21 = scalar_lea.hbm %s760_s0, 128 }
  0x16   :  { %p576_p8 = scmp.ne.s32.totalorder %s760_s0, %s575_s21  ;;  %p579_p9 = scmp.lt.u32.totalorder %s575_s21, %s760_s0 }
  0x18   :  { %p581_p10 = pnand %p579_p9, %p576_p8 }
  0x1a   :  { %584 = shalt.err (!%p581_p10)
}
  0x1b   :  { %s585_s1 = scalar_lea.vmem %s22_s16, 128  ;;  %p590_p12 = scmp.lt.s32.totalorder %s22_s16, %s22_s16 }
  0x1c   :  { %p586_p11 = scmp.ne.s32.totalorder %s22_s16, %s585_s1  ;;  %p591_p13 = scmp.lt.s32.totalorder %s585_s1, %s585_s1 }
  0x1e   :  { %p592_p0 = por %p591_p13, %p590_p12 }
  0x20   :  { %p593_p1 = pnand %p592_p0, %p586_p11 }
  0x22   :  { %596 = shalt.err (!%p593_p1)
}
  0x23   :  { %24 = dma.hbm_to_vmem [thread:$0]  %s760_s0, 128, %s22_s16, [#allocation3]  }
  0x24   :  { %s597_s30 = scalar_lea.hbm %s763_s3, 4096 }
  0x25   :  { %p598_p2 = scmp.ne.s32.totalorder %s763_s3, %s597_s30  ;;  %p601_p3 = scmp.lt.u32.totalorder %s597_s30, %s763_s3 }
  0x27   :  { %p603_p4 = pnand %p601_p3, %p598_p2 }
  0x29   :  { %606 = shalt.err (!%p603_p4)
}
  0x2a   :  { %s607_s12 = scalar_lea.vmem %s45_s18, 4096  ;;  %p612_p6 = scmp.lt.s32.totalorder %s45_s18, %s45_s18 }
  0x2b   :  { %p608_p5 = scmp.ne.s32.totalorder %s45_s18, %s607_s12  ;;  %p613_p7 = scmp.lt.s32.totalorder %s607_s12, %s607_s12 }
  0x2d   :  { %p614_p8 = por %p613_p7, %p612_p6 }
  0x2f   :  { %p615_p9 = pnand %p614_p8, %p608_p5 }
  0x31   :  { %618 = shalt.err (!%p615_p9)
}
  0x32   :  { %s652_s0 = smov 128   ;;  %s653_s13 = smov 8  }
  0x33   :  { %50 = dma.hbm_to_vmem [thread:$0]  %s763_s3, 4096, %s45_s18, [#allocation5], %s652_s0, %s652_s0, %s653_s13  }
  0x34   :  { %s654_s16 = smov [#allocation7]   ;;  %s619_s21 = scalar_lea.hbm %s765_s5, 2048 }
  0x35   :  { %s58_s17 = sshll.u32 %s654_s16, 4  ;;  %p620_p10 = scmp.ne.s32.totalorder %s765_s5, %s619_s21  ;;  %s59_s17 = int_to_ptr.vmem [resolvable:$true] %s58_s17 }
  0x36   :  { %p623_p11 = scmp.lt.u32.totalorder %s619_s21, %s765_s5 }
  0x38   :  { %p625_p12 = pnand %p623_p11, %p620_p10 }
  0x3a   :  { %628 = shalt.err (!%p625_p12)
}
  0x3b   :  { %s629_s1 = scalar_lea.vmem %s59_s17, 2048  ;;  %p634_p0 = scmp.lt.s32.totalorder %s59_s17, %s59_s17 }
  0x3c   :  { %p630_p13 = scmp.ne.s32.totalorder %s59_s17, %s629_s1  ;;  %p635_p1 = scmp.lt.s32.totalorder %s629_s1, %s629_s1 }
  0x3e   :  { %p636_p2 = por %p635_p1, %p634_p0 }
  0x40   :  { %p637_p3 = pnand %p636_p2, %p630_p13 }
  0x42   :  { %640 = shalt.err (!%p637_p3)
}
  0x43   :  { %64 = dma.hbm_to_vmem [thread:$0]  %s765_s5, 2048, %s59_s17, [#allocation8], %s652_s0, %s652_s0, %s653_s13  }
  0x44   :  { %641 = dma.done.wait [#allocation3], 128  }
  0x45   :  { %642 = vsyncadd [#allocation3], 4294967168 }
  0x46   :  { %643 = dma.done.wait [#allocation5], 5120  }
  0x47   :  { %644 = vsyncadd [#allocation5], 4294962176 }
  0x48   :  { %645 = dma.done.wait [#allocation8], 2048  }
  0x49   :  { %646 = vsyncadd [#allocation8], 4294965248  ;;  %v655_v0 = vmov 0.0   ;;  %v81_v1 = vld [vmem:[#allocation4 + $0x8] sm:$0xff]  ;;  %v83_v2 = vld [vmem:[#allocation4 + $0x18] sm:$0xff]  ;;  %vm100_vm0 = vcmask 261120  }
  0x4a   :  { %168 = vmatprep.mubr.f32.mxu0 %v655_v0  ;;  %v80_v3 = vld [vmem:[#allocation4] sm:$0xff]  ;;  %v478_v4 = vpack.c.bf16 %v83_v2, %v81_v1  ;;  %v82_v5 = vld [vmem:[#allocation4 + $0x10] sm:$0xff]  ;;  %v85_v6 = vld [vmem:[#allocation4 + $0x28] sm:$0xff]  ;;  %v656_v2 = vmov 0.0|0.0   ;;  %vm657_vm1 = vmmov 0  }
  0x4b   :  { %v87_v7 = vld [vmem:[#allocation4 + $0x38] sm:$0xff]  ;;  %v480_v8 = vpack.c.bf16 %v82_v5, %v80_v3  ;;  %v84_v10 = vld [vmem:[#allocation4 + $0x20] sm:$0xff]  ;;  %v86_v11 = vld [vmem:[#allocation4 + $0x30] sm:$0xff] }
  0x4c   :  { %v482_v9 = vpack.c.bf16 %v87_v7, %v85_v6  ;;  %479 = vmatprep.subr.bf16.mxu0 %v478_v4  ;;  %v193_v12 = vld [vmem:[#allocation6 + $0x80] sm:$0xff]  ;;  %v194_v13 = vld [vmem:[#allocation6 + $0x88] sm:$0xff]  ;;  %v484_v15 = vpack.c.bf16 %v86_v11, %v84_v10  ;;  %v195_v18 = vld [vmem:[#allocation6 + $0x90] sm:$0xff] }
  0x4d   :  { %v177_v14 = vld [vmem:[#allocation6] sm:$0xff]  ;;  %481 = vmatpush1.bf16.msra.mxu0 %v480_v8  ;;  %v486_v16 = vpack.c.bf16 %v194_v13, %v193_v12  ;;  %v178_v17 = vld [vmem:[#allocation6 + $0x8] sm:$0xff]  ;;  %v196_v19 = vld [vmem:[#allocation6 + $0x98] sm:$0xff] }
  0x4e   :  { %483 = vmatprep.subr.bf16.mxu0 %v482_v9  ;;  %v488_v20 = vpack.c.bf16 %v178_v17, %v177_v14  ;;  %v490_v21 = vpack.c.bf16 %v196_v19, %v195_v18  ;;  %v179_v22 = vld [vmem:[#allocation6 + $0x10] sm:$0xff]  ;;  %v180_v23 = vld [vmem:[#allocation6 + $0x18] sm:$0xff]  ;;  %v197_v24 = vld [vmem:[#allocation6 + $0xa0] sm:$0xff]  ;;  %v90_v18 = vlaneseq }
  0x4f   :  { %487 = vmatprep.subr.bf16.mxu1 %v486_v16  ;;  %v198_v25 = vld [vmem:[#allocation6 + $0xa8] sm:$0xff]  ;;  %v492_v26 = vpack.c.bf16 %v180_v23, %v179_v22  ;;  %v79_v27 = vld [vmem:[#allocation2] sm:$0xff]  ;;  %v181_v29 = vld [vmem:[#allocation6 + $0x20] sm:$0xff] }
  0x50   :  { %489 = vmatpush3.bf16.msra.mxu1 %v488_v20  ;;  %v494_v28 = vpack.c.bf16 %v198_v25, %v197_v24  ;;  %v182_v30 = vld [vmem:[#allocation6 + $0x28] sm:$0xff]  ;;  %v199_v31 = vld [vmem:[#allocation6 + $0xb0] sm:$0xff]  ;;  %v200_v32 = vld [vmem:[#allocation6 + $0xb8] sm:$0xff]  ;;  %v91_v19 = vshrl.u32 %v90_v18, 7 }
  0x51   :  { %485 = vmatpush1.bf16.msra.mxu0 %v484_v15  ;;  %491 = vmatprep.subr.bf16.mxu1 %v490_v21  ;;  %v496_v33 = vpack.c.bf16 %v182_v30, %v181_v29  ;;  %v498_v34 = vpack.c.bf16 %v200_v32, %v199_v31  ;;  %v183_v35 = vld [vmem:[#allocation6 + $0x30] sm:$0xff]  ;;  %v184_v36 = vld [vmem:[#allocation6 + $0x38] sm:$0xff]  ;;  %v201_v37 = vld [vmem:[#allocation6 + $0xc0] sm:$0xff] }
  0x52   :  { %v202_v38 = vld [vmem:[#allocation6 + $0xc8] sm:$0xff]  ;;  %v500_v39 = vpack.c.bf16 %v184_v36, %v183_v35  ;;  %v185_v41 = vld [vmem:[#allocation6 + $0x40] sm:$0xff]  ;;  %v203_v43 = vld [vmem:[#allocation6 + $0xd0] sm:$0xff]  ;;  %518 = vmatprep.subr.bf16.mxu0 %v656_v2  ;;  %v92_v20 = vsub.s32 0, %v91_v19  ;;  %v96_v22 = vsub.s32 1, %v91_v19 }
  0x53   :  { %v502_v40 = vpack.c.bf16 %v202_v38, %v201_v37  ;;  %v186_v42 = vld [vmem:[#allocation6 + $0x48] sm:$0xff]  ;;  %v204_v44 = vld [vmem:[#allocation6 + $0xd8] sm:$0xff]  ;;  %v187_v47 = vld [vmem:[#allocation6 + $0x50] sm:$0xff] }
  0x54   :  { %388 = vmatmul.mubr.msk.f32.vlgmr.msra.gmra.mrb[0].mxu0 %vm100_vm0, %v79_v27  ;;  %493 = vmatpush3.bf16.msra.mxu1 %v492_v26  ;;  %v504_v45 = vpack.c.bf16 %v186_v42, %v185_v41  ;;  %v506_v46 = vpack.c.bf16 %v204_v44, %v203_v43  ;;  %v188_v48 = vld [vmem:[#allocation6 + $0x58] sm:$0xff]  ;;  %v205_v49 = vld [vmem:[#allocation6 + $0xe0] sm:$0xff]  ;;  %v206_v50 = vld [vmem:[#allocation6 + $0xe8] sm:$0xff] }
  0x55   :  { %495 = vmatprep.subr.bf16.mxu1 %v494_v28  ;;  %v508_v51 = vpack.c.bf16 %v188_v48, %v187_v47  ;;  %v510_v52 = vpack.c.bf16 %v206_v50, %v205_v49  ;;  %v189_v53 = vld [vmem:[#allocation6 + $0x60] sm:$0xff]  ;;  %v190_v54 = vld [vmem:[#allocation6 + $0x68] sm:$0xff]  ;;  %v207_v56 = vld [vmem:[#allocation6 + $0xf0] sm:$0xff]  ;;  %475 = vmatprep.mubr.msk.f32.mxu0 %vm657_vm1, %v655_v0 }
  0x56   :  { %v512_v55 = vpack.c.bf16 %v190_v54, %v189_v53  ;;  %v208_v57 = vld [vmem:[#allocation6 + $0xf8] sm:$0xff]  ;;  %v191_v59 = vld [vmem:[#allocation6 + $0x70] sm:$0xff]  ;;  %v287_v62 = vld [vmem:[#allocation7] sm:$0xff] }
  0x57   :  { %v514_v58 = vpack.c.bf16 %v208_v57, %v207_v56  ;;  %v192_v60 = vld [vmem:[#allocation6 + $0x78] sm:$0xff]  ;;  %v288_v63 = vld [vmem:[#allocation7 + $0x8] sm:$0xff]  ;;  %v289_v1 = vld [vmem:[#allocation7 + $0x10] sm:$0xff] }
  0x58   :  { %497 = vmatpush3.bf16.msra.mxu1 %v496_v33  ;;  %v516_v61 = vpack.c.bf16 %v192_v60, %v191_v59  ;;  %v519_v3 = vpack.c.bf16 %v288_v63, %v287_v62  ;;  %v290_v4 = vld [vmem:[#allocation7 + $0x18] sm:$0xff]  ;;  %v291_v6 = vld [vmem:[#allocation7 + $0x20] sm:$0xff]  ;;  %v292_v7 = vld [vmem:[#allocation7 + $0x28] sm:$0xff] }
  0x59   :  { %499 = vmatprep.subr.bf16.mxu1 %v498_v34  ;;  %v522_v5 = vpack.c.bf16 %v290_v4, %v289_v1  ;;  %v525_v8 = vpack.c.bf16 %v292_v7, %v291_v6  ;;  %v293_v9 = vld [vmem:[#allocation7 + $0x30] sm:$0xff]  ;;  %v294_v10 = vld [vmem:[#allocation7 + $0x38] sm:$0xff]  ;;  %v295_v12 = vld [vmem:[#allocation7 + $0x40] sm:$0xff] }
  0x5a   :  { %520 = vmatpush3.bf16.msra.mxu0 %v519_v3  ;;  %v528_v11 = vpack.c.bf16 %v294_v10, %v293_v9  ;;  %v296_v13 = vld [vmem:[#allocation7 + $0x48] sm:$0xff]  ;;  %v297_v15 = vld [vmem:[#allocation7 + $0x50] sm:$0xff]  ;;  %v298_v16 = vld [vmem:[#allocation7 + $0x58] sm:$0xff] }
  0x5b   :  { %521 = vmatprep.subr.bf16.mxu0 %v656_v2  ;;  %v531_v14 = vpack.c.bf16 %v296_v13, %v295_v12  ;;  %v534_v17 = vpack.c.bf16 %v298_v16, %v297_v15  ;;  %v88_v21 = vld [vmem:[%s762_s2] sm:$0x3]  ;;  %v299_v31 = vld [vmem:[#allocation7 + $0x60] sm:$0xff]  ;;  %v300_v32 = vld [vmem:[#allocation7 + $0x68] sm:$0xff] }
  0x5c   :  { %501 = vmatpush3.bf16.msra.mxu1 %v500_v39  ;;  %v93_v23 = vrot.slane %v88_v21, %v92_v20  ;;  %v97_v24 = vrot.slane %v88_v21, %v96_v22  ;;  %v537_v33 = vpack.c.bf16 %v300_v32, %v299_v31  ;;  %v301_v34 = vld [vmem:[#allocation7 + $0x70] sm:$0xff]  ;;  %v302_v35 = vld [vmem:[#allocation7 + $0x78] sm:$0xff] }
  0x5d   :  { %503 = vmatprep.subr.bf16.mxu1 %v502_v40  ;;  %v540_v36 = vpack.c.bf16 %v302_v35, %v301_v34  ;;  %v389_v38 = vld [vmem:[%s764_s4] ss:$0 sm:$0xff] }
  0x5e   :  { %523 = vmatpush3.bf16.msra.mxu0 %v522_v5  ;;  %v390_v43 = vld [vmem:[%s766_s6] ss:$0 sm:$0xff] }
  0x5f   :  { %524 = vmatprep.subr.bf16.mxu0 %v656_v2 }
  0x60   :  { %505 = vmatpush3.bf16.msra.mxu1 %v504_v45 }
  0x61   :  { %507 = vmatprep.subr.bf16.mxu1 %v506_v46 }
  0x62   :  { %526 = vmatpush3.bf16.msra.mxu0 %v525_v8 }
  0x63   :  { %527 = vmatprep.subr.bf16.mxu0 %v656_v2 }
  0x64   :  { %509 = vmatpush3.bf16.msra.mxu1 %v508_v51 }
  0x65   :  { %511 = vmatprep.subr.bf16.mxu1 %v510_v52 }
  0x66   :  { %529 = vmatpush3.bf16.msra.mxu0 %v528_v11 }
  0x67   :  { %530 = vmatprep.subr.bf16.mxu0 %v656_v2 }
  0x68   :  { %513 = vmatpush3.bf16.msra.mxu1 %v512_v55 }
  0x69   :  { %515 = vmatprep.subr.bf16.mxu1 %v514_v58 }
  0x6a   :  { %532 = vmatpush3.bf16.msra.mxu0 %v531_v14 }
  0x6b   :  { %533 = vmatprep.subr.bf16.mxu0 %v656_v2 }
  0x6c   :  { %517 = vmatpush3.bf16.msra.mxu1 %v516_v61 }
  0x6e   :  { %535 = vmatpush3.bf16.msra.mxu0 %v534_v17 }
  0x6f   :  { %536 = vmatprep.subr.bf16.mxu0 %v656_v2 }
  0x72   :  { %538 = vmatpush3.bf16.msra.mxu0 %v537_v33 }
  0x73   :  { %539 = vmatprep.subr.bf16.mxu0 %v656_v2 }
  0x76   :  { %541 = vmatpush3.bf16.msra.mxu0 %v540_v36 }
 0x127   :  { %v170_v25 = vpop.f32.mrb[0].mxu0 }
 0x128   :  { %v171_v26 = vadd.f32 %v170_v25, %v93_v23  ;;  %v172_v27 = vpop.f32.mrb[1].mxu0 }
 0x129   :  { %v173_v28 = vadd.f32 %v172_v27, %v97_v24 }
 0x12a   :  { %v175_v30 = vmax.f32 %v171_v26, 0.0 }
 0x12b   :  { %v176_v29 = vmax.f32 %v173_v28, 0.0 }
 0x12d   :  { %280 = vmatprep.mubr.f32.mxu1 %v176_v29 }
 0x12e   :  { %281 = vmatmul.mubr.f32.vlgmr.msra.gmra.mrb[0].mxu1 %v175_v30 }
 0x201   :  { %v423_v37 = vpop.f32.mrb[0].mxu1 }
 0x202   :  { %v424_v39 = vpop.f32.mrb[1].mxu1 }
 0x203   :  { %v425_v40 = vadd.f32 %v424_v39, %v423_v37 }
 0x205   :  { %v283_v41 = vadd.f32 %v425_v40, %v389_v38 }
 0x207   :  { %v286_v42 = vmax.f32 %v283_v41, 0.0 }
 0x209   :  { %476 = vmatmul.mubr.f32.vlgmr.msra.gmra.mrb[2].mxu0 %v286_v42 }
 0x2dc   :  { %v376_v44 = vpop.f32.mrb[2].mxu0 }
 0x2dd   :  { %v377_v45 = vadd.f32 %v390_v43, %v376_v44  ;;  %v477_v46 = vpop.f32.mrb[3].mxu0 }
 0x2df   :  { %380 = vst [vmem:[%s767_s7] sm:$0xff] %v377_v45 }
 0x2e0   :  { %385 = vsyncpa [#allocation3], 1 }
 0x2e1   :  { %386 = vsyncpa [#allocation5], 1 }
 0x2e2   :  { %387 = vsyncpa [#allocation8], 1 }

</bundles_post_ra>
